<compile_context>
chip_gen: v6e
topology: v6e:2x2x1
jax: 0.10.0
libtpu: 0.0.40
codegen_flags: <defaults>
</compile_context>

<pallas_src>
import jax
import jax.numpy as jnp
from jax.experimental import pallas as pl
from jax.experimental.pallas import tpu as pltpu

LANE = 128     # hidden feature dims padded to 128 lanes (lane-dense vregs)
OUT_ALIGN = 8  # output features padded only to 8 (narrow, contiguous writeback)


def mlp_kernel(x_ref, w1_ref, b1_ref, w2_ref, b2_ref, w3_ref, b3_ref, o_ref):
    # x arrives f32 straight from HBM; cast to bf16 in-kernel (free VPU op,
    # avoids a separate wrapper-side cast pass over x).
    x = x_ref[...].astype(jnp.bfloat16)
    # Layer 1: Linear(15 -> 128-padded 100), bf16 operands on MXU, f32 acc.
    h = jnp.dot(x, w1_ref[...], preferred_element_type=jnp.float32)
    h = jnp.maximum(h + b1_ref[...], 0.0)          # f32 bias + ReLU (VPU)
    # Dropout(p=0.25) is identity in eval mode.
    # Layer 2: Linear(128 -> 128).
    h = jnp.dot(h.astype(jnp.bfloat16), w2_ref[...],
                preferred_element_type=jnp.float32)
    h = jnp.maximum(h + b2_ref[...], 0.0)
    # Output layer: Linear(128 -> 8-padded 3); narrow contiguous bf16 store.
    out = jnp.dot(h.astype(jnp.bfloat16), w3_ref[...],
                  preferred_element_type=jnp.float32)
    o_ref[...] = (out + b3_ref[...]).astype(o_ref.dtype)


def _round_up(n, m):
    return (n + m - 1) // m * m


def _pad2d(a, rows, cols, dtype):
    out = jnp.zeros((rows, cols), dtype)
    return out.at[: a.shape[0], : a.shape[1]].set(a.astype(dtype))


def _choose_batch_tile(batch, block_b):
    """16-aligned batch tile such that (a) padding waste < one tile and
    (b) the grid has >= 2 steps once the batch is big enough to shard across
    v7x's two TensorCores (no effect on single-TC v5e/v6e)."""
    min_steps = 2 if batch >= 512 else 1
    n_steps = max(min_steps, pl.cdiv(batch, block_b))
    return _round_up(pl.cdiv(batch, n_steps), 16)


def mlp_forward(x, params, block_b=1024):
    """Fused eval-mode forward of the 15 -> 100 -> 100 -> 3 MLP."""
    w1, b1, w2, b2, w3, b3 = params
    B, n_in = x.shape
    hidden = w1.shape[1]
    n_out = w3.shape[1]
    h_pad = _round_up(hidden, LANE)      # 100 -> 128
    o_pad = _round_up(n_out, OUT_ALIGN)  # 3   -> 8

    # Zero-padded, lane-dense weights (bf16 matmul operands) and biases (f32).
    # Padding rows/cols are exactly zero, so results are unchanged.
    w1p = _pad2d(w1, n_in, h_pad, jnp.bfloat16)
    b1p = _pad2d(b1, 1, h_pad, jnp.float32)
    w2p = _pad2d(w2, h_pad, h_pad, jnp.bfloat16)
    b2p = _pad2d(b2, 1, h_pad, jnp.float32)
    w3p = _pad2d(w3, h_pad, o_pad, jnp.bfloat16)
    b3p = _pad2d(b3, 1, o_pad, jnp.float32)

    tb = _choose_batch_tile(B, block_b)
    b_padded = _round_up(B, tb)
    xp = x
    if b_padded != B:
        xp = jnp.zeros((b_padded, n_in), x.dtype).at[:B].set(x)

    grid = (b_padded // tb,)
    row_spec = lambda w: pl.BlockSpec((tb, w), lambda i: (i, 0))
    const_spec = lambda a: pl.BlockSpec(a.shape, lambda i: (0, 0))

    out = pl.pallas_call(
        mlp_kernel,
        out_shape=jax.ShapeDtypeStruct((b_padded, o_pad), jnp.bfloat16),
        grid=grid,
        in_specs=[row_spec(n_in),
                  const_spec(w1p), const_spec(b1p),
                  const_spec(w2p), const_spec(b2p),
                  const_spec(w3p), const_spec(b3p)],
        out_specs=row_spec(o_pad),
        compiler_params=pltpu.CompilerParams(
            dimension_semantics=("parallel",)),
    )(xp, w1p, b1p, w2p, b2p, w3p, b3p)

    # Narrow (B, 3) slice of an 8-lane bf16 output: ~16 B/row of writeback
    # instead of the 512 B/row a 128-wide f32 padded output would cost.
    return out[:B, :n_out].astype(jnp.float32)


def init_params(key, n_in=15, n_hidden=100, n_out=3):
    """Deterministic init mimicking nn.Linear default (U[-1/sqrt(fan_in), +])."""
    def linear(k, fan_in, fan_out):
        kw, kb = jax.random.split(k)
        bound = 1.0 / jnp.sqrt(fan_in)
        w = jax.random.uniform(kw, (fan_in, fan_out), jnp.float32, -bound, bound)
        b = jax.random.uniform(kb, (1, fan_out), jnp.float32, -bound, bound)
        return w, b

    k1, k2, k3 = jax.random.split(key, 3)
    w1, b1 = linear(k1, n_in, n_hidden)
    w2, b2 = linear(k2, n_hidden, n_hidden)
    w3, b3 = linear(k3, n_hidden, n_out)
    return (w1, b1, w2, b2, w3, b3)


def mlp_ref(x, params):
    w1, b1, w2, b2, w3, b3 = params
    h = jnp.maximum(x @ w1 + b1, 0.0)
    h = jnp.maximum(h @ w2 + b2, 0.0)
    return h @ w3 + b3


if __name__ == "__main__":
    key = jax.random.PRNGKey(0)
    kx, kp = jax.random.split(key)

    B, N_IN, HIDDEN, N_OUT = 8, 15, 100, 3
    x = jax.random.normal(kx, (B, N_IN), dtype=jnp.float32)
    params = init_params(kp, n_in=N_IN, n_hidden=HIDDEN, n_out=N_OUT)

    out = jax.block_until_ready(mlp_forward(x, params))
    ref = mlp_ref(x, params)

    assert out.shape == (B, N_OUT)
    err = float(jnp.max(jnp.abs(out - ref)))
    # bf16 matmul operands + bf16 output storage -> loosened tolerance vs the
    # f32 reference.
    assert jnp.allclose(out, ref, atol=3e-2, rtol=3e-2), err

    print("KERNEL_OK")
</pallas_src>

<mosaic_0001>
module attributes {stable_mosaic.version = 11 : i64} {
  func.func @mlp_kernel(%arg0: i32, %arg1: memref<16x15xf32, #tpu.memory_space<vmem>>, %arg2: memref<15x128xbf16, #tpu.memory_space<vmem>>, %arg3: memref<1x128xf32, #tpu.memory_space<vmem>>, %arg4: memref<128x128xbf16, #tpu.memory_space<vmem>>, %arg5: memref<1x128xf32, #tpu.memory_space<vmem>>, %arg6: memref<128x8xbf16, #tpu.memory_space<vmem>>, %arg7: memref<1x8xf32, #tpu.memory_space<vmem>>, %arg8: memref<16x8xbf16, #tpu.memory_space<vmem>>) attributes {dimension_semantics = [#tpu.dimension_semantics<parallel>], iteration_bounds = array<i64: 1>, scalar_prefetch = 0 : i64, scratch_operands = 0 : i64, tpu.core_type = #tpu.core_type<tc>, window_params = [{transform_indices = @transform_0, window_bounds = array<i64: 16, 15>}, {pipeline_mode = #tpu.pipeline_mode<synchronous>, transform_indices = @transform_1, window_bounds = array<i64: 15, 128>}, {pipeline_mode = #tpu.pipeline_mode<synchronous>, transform_indices = @transform_2, window_bounds = array<i64: 1, 128>}, {pipeline_mode = #tpu.pipeline_mode<synchronous>, transform_indices = @transform_3, window_bounds = array<i64: 128, 128>}, {pipeline_mode = #tpu.pipeline_mode<synchronous>, transform_indices = @transform_4, window_bounds = array<i64: 1, 128>}, {pipeline_mode = #tpu.pipeline_mode<synchronous>, transform_indices = @transform_5, window_bounds = array<i64: 128, 8>}, {pipeline_mode = #tpu.pipeline_mode<synchronous>, transform_indices = @transform_6, window_bounds = array<i64: 1, 8>}, {transform_indices = @transform_7, window_bounds = array<i64: 16, 8>}]} {
    %c0 = arith.constant 0 : index
    %c0_0 = arith.constant 0 : index
    %0 = vector.load %arg1[%c0, %c0_0] : memref<16x15xf32, #tpu.memory_space<vmem>>, vector<16x15xf32>
    %1 = arith.truncf %0 : vector<16x15xf32> to vector<16x15xbf16>
    %c0_1 = arith.constant 0 : index
    %c0_2 = arith.constant 0 : index
    %2 = vector.load %arg2[%c0_1, %c0_2] : memref<15x128xbf16, #tpu.memory_space<vmem>>, vector<15x128xbf16>
    %cst = arith.constant dense<0.000000e+00> : vector<16x128xf32>
    %3 = tpu.matmul %1, %2, %cst {dimension_numbers = #tpu.dot_dimension_numbers<[1], [0], [0], [1], [0, 0, 1, 1], [], []>} : vector<16x15xbf16>, vector<15x128xbf16>, vector<16x128xf32> -> vector<16x128xf32>
    %c0_3 = arith.constant 0 : index
    %c0_4 = arith.constant 0 : index
    %4 = vector.load %arg3[%c0_3, %c0_4] : memref<1x128xf32, #tpu.memory_space<vmem>>, vector<1x128xf32>
    %5 = vector.broadcast %4 : vector<1x128xf32> to vector<16x128xf32>
    %6 = arith.addf %3, %5 : vector<16x128xf32>
    %cst_5 = arith.constant 0.000000e+00 : f32
    %7 = vector.broadcast %cst_5 : f32 to vector<16x128xf32>
    %8 = arith.maximumf %6, %7 : vector<16x128xf32>
    %9 = arith.truncf %8 : vector<16x128xf32> to vector<16x128xbf16>
    %c0_6 = arith.constant 0 : index
    %c0_7 = arith.constant 0 : index
    %10 = vector.load %arg4[%c0_6, %c0_7] : memref<128x128xbf16, #tpu.memory_space<vmem>>, vector<128x128xbf16>
    %cst_8 = arith.constant dense<0.000000e+00> : vector<16x128xf32>
    %11 = tpu.matmul %9, %10, %cst_8 {dimension_numbers = #tpu.dot_dimension_numbers<[1], [0], [0], [1], [0, 0, 1, 1], [], []>} : vector<16x128xbf16>, vector<128x128xbf16>, vector<16x128xf32> -> vector<16x128xf32>
    %c0_9 = arith.constant 0 : index
    %c0_10 = arith.constant 0 : index
    %12 = vector.load %arg5[%c0_9, %c0_10] : memref<1x128xf32, #tpu.memory_space<vmem>>, vector<1x128xf32>
    %13 = vector.broadcast %12 : vector<1x128xf32> to vector<16x128xf32>
    %14 = arith.addf %11, %13 : vector<16x128xf32>
    %cst_11 = arith.constant 0.000000e+00 : f32
    %15 = vector.broadcast %cst_11 : f32 to vector<16x128xf32>
    %16 = arith.maximumf %14, %15 : vector<16x128xf32>
    %17 = arith.truncf %16 : vector<16x128xf32> to vector<16x128xbf16>
    %c0_12 = arith.constant 0 : index
    %c0_13 = arith.constant 0 : index
    %18 = vector.load %arg6[%c0_12, %c0_13] : memref<128x8xbf16, #tpu.memory_space<vmem>>, vector<128x8xbf16>
    %cst_14 = arith.constant dense<0.000000e+00> : vector<16x8xf32>
    %19 = tpu.matmul %17, %18, %cst_14 {dimension_numbers = #tpu.dot_dimension_numbers<[1], [0], [0], [1], [0, 0, 1, 1], [], []>} : vector<16x128xbf16>, vector<128x8xbf16>, vector<16x8xf32> -> vector<16x8xf32>
    %c0_15 = arith.constant 0 : index
    %c0_16 = arith.constant 0 : index
    %20 = vector.load %arg7[%c0_15, %c0_16] : memref<1x8xf32, #tpu.memory_space<vmem>>, vector<1x8xf32>
    %21 = vector.broadcast %20 : vector<1x8xf32> to vector<16x8xf32>
    %22 = arith.addf %19, %21 : vector<16x8xf32>
    %23 = arith.truncf %22 : vector<16x8xf32> to vector<16x8xbf16>
    %c0_17 = arith.constant 0 : index
    %c0_18 = arith.constant 0 : index
    %24 = vector.load %arg8[%c0_17, %c0_18] : memref<16x8xbf16, #tpu.memory_space<vmem>>, vector<16x8xbf16>
    tpu.vector_store %arg8[%c0_17, %c0_18], %23 {strides = array<i32>} : memref<16x8xbf16, #tpu.memory_space<vmem>>, vector<16x8xbf16>,
    return
  }
  func.func @transform_0(%arg0: i32) -> (i32, i32) {
    %c0_i32 = arith.constant 0 : i32
    %c0_i32_0 = arith.constant 0 : i32
    return %arg0, %c0_i32 : i32, i32
  }
  func.func @transform_1(%arg0: i32) -> (i32, i32) {
    %c0_i32 = arith.constant 0 : i32
    %c0_i32_0 = arith.constant 0 : i32
    %c0_i32_1 = arith.constant 0 : i32
    return %c0_i32, %c0_i32_0 : i32, i32
  }
  func.func @transform_2(%arg0: i32) -> (i32, i32) {
    %c0_i32 = arith.constant 0 : i32
    %c0_i32_0 = arith.constant 0 : i32
    %c0_i32_1 = arith.constant 0 : i32
    return %c0_i32, %c0_i32_0 : i32, i32
  }
  func.func @transform_3(%arg0: i32) -> (i32, i32) {
    %c0_i32 = arith.constant 0 : i32
    %c0_i32_0 = arith.constant 0 : i32
    %c0_i32_1 = arith.constant 0 : i32
    return %c0_i32, %c0_i32_0 : i32, i32
  }
  func.func @transform_4(%arg0: i32) -> (i32, i32) {
    %c0_i32 = arith.constant 0 : i32
    %c0_i32_0 = arith.constant 0 : i32
    %c0_i32_1 = arith.constant 0 : i32
    return %c0_i32, %c0_i32_0 : i32, i32
  }
  func.func @transform_5(%arg0: i32) -> (i32, i32) {
    %c0_i32 = arith.constant 0 : i32
    %c0_i32_0 = arith.constant 0 : i32
    %c0_i32_1 = arith.constant 0 : i32
    return %c0_i32, %c0_i32_0 : i32, i32
  }
  func.func @transform_6(%arg0: i32) -> (i32, i32) {
    %c0_i32 = arith.constant 0 : i32
    %c0_i32_0 = arith.constant 0 : i32
    %c0_i32_1 = arith.constant 0 : i32
    return %c0_i32, %c0_i32_0 : i32, i32
  }
  func.func @transform_7(%arg0: i32) -> (i32, i32) {
    %c0_i32 = arith.constant 0 : i32
    %c0_i32_0 = arith.constant 0 : i32
    return %arg0, %c0_i32 : i32, i32
  }
}

</mosaic_0001>

<bundles_post_ra>
// kernel: tpu_custom_call.1
= control target key start
LH: loop header
LB: loop body
LE: loop exit
PB: predicated region body
PF: predicated region fallthrough
CT: control target
= control target key end

     0   :  { %12 = vsyncpa [#allocation3], 0  ;;  %s667_s0 = inlined_call_operand.hbm [shape: f32[16,15], index: 0, kind: input, shape index: {}]   ;;  %s668_s1 = inlined_call_operand.vmem [shape: bf16[15,128], index: 1, kind: input, shape index: {}]   ;;  %s669_s2 = inlined_call_operand.vmem [shape: f32[1,128], index: 2, kind: input, shape index: {}]   ;;  %s670_s3 = inlined_call_operand.vmem [shape: bf16[128,128], index: 3, kind: input, shape index: {}]   ;;  %s671_s4 = inlined_call_operand.hbm [shape: f32[1,128], index: 4, kind: input, shape index: {}]   ;;  %s672_s5 = inlined_call_operand.vmem [shape: bf16[128,8], index: 5, kind: input, shape index: {}]   ;;  %s673_s6 = inlined_call_operand.vmem [shape: f32[1,8], index: 6, kind: input, shape index: {}]   ;;  %s674_s7 = inlined_call_operand.vmem [shape: bf16[16,8], index: 7, kind: output, shape index: {}]  }
   0x1   :  { %13 = vsyncpa [#allocation5], 0  ;;  %s528_s24 = smov [#allocation2]  }
   0x2   :  { %s19_s25 = sshll.u32 %s528_s24, 4  ;;  %s20_s25 = int_to_ptr.vmem [resolvable:$true] %s19_s25 }
   0x3   :  { %s492_s26 = scalar_lea.vmem %s20_s25, 256  ;;  %p497_p1 = scmp.lt.s32.totalorder %s20_s25, %s20_s25 }
   0x4   :  { %p493_p0 = scmp.ne.s32.totalorder %s20_s25, %s492_s26  ;;  %p498_p2 = scmp.lt.s32.totalorder %s492_s26, %s492_s26 }
   0x6   :  { %p499_p3 = por %p498_p2, %p497_p1 }
   0x8   :  { %p500_p4 = pnand %p499_p3, %p493_p0 }
   0xa   :  { %503 = shalt.err (!%p500_p4)
}
   0xb   :  { %s529_s27 = smov 128   ;;  %s530_s28 = smov 8  }
   0xc   :  { %25 = dma.hbm_to_vmem [thread:$0]  %s667_s0, 256, %s20_s25, [#allocation3], %s529_s27, %s529_s27, %s530_s28  }
   0xd   :  { %s531_s8 = smov [#allocation4]  }
   0xe   :  { %s38_s9 = sshll.u32 %s531_s8, 4  ;;  %s39_s9 = int_to_ptr.vmem [resolvable:$true] %s38_s9 }
   0xf   :  { %s512_s10 = scalar_lea.vmem %s39_s9, 16  ;;  %s516_s11 = scalar_lea.vmem %s39_s9, 32 }
  0x10   :  { %p513_p5 = scmp.ne.s32.totalorder %s39_s9, %s512_s10  ;;  %p517_p6 = scmp.lt.s32.totalorder %s39_s9, %s39_s9 }
  0x11   :  { %p518_p7 = scmp.lt.s32.totalorder %s516_s11, %s512_s10 }
  0x13   :  { %p519_p8 = por %p518_p7, %p517_p6 }
  0x15   :  { %p520_p9 = pnand %p519_p8, %p513_p5 }
  0x17   :  { %523 = shalt.err (!%p520_p9)
}
  0x18   :  { %41 = dma.hbm_to_vmem [thread:$0]  %s671_s4, 16, %s39_s9, [#allocation5]  }
  0x19   :  { %524 = dma.done.wait [#allocation3], 256  }
  0x1a   :  { %525 = vsyncadd [#allocation3], 4294967040 }
  0x1b   :  { %526 = dma.done.wait [#allocation5], 16  }
  0x1c   :  { %527 = vsyncadd [#allocation5], 4294967280  ;;  %vm74_vm0 = vcmask 1046528   ;;  %v532_v0 = vmov 0.0   ;;  %vm533_vm1 = vmmov 0   ;;  %vm75_vm2 = vcmask 1047552  }
  0x1d   :  { %414 = vmatprep.subr.bf16.mxu0 %v532_v0  ;;  %420 = vmatprep.subr.bf16.mxu1 %v532_v0  ;;  %v534_v1 = vmov 65535   ;;  %v467_v4 = vld [vmem:[%s668_s1] sm:$0xff]   ;;  %v54_v6 = vld [vmem:[#allocation2 + $0x8] sm:$0xff]  ;;  %v468_v8 = vld [vmem:[%s670_s3 + $0x38] sm:$0xff]   ;;  %vm70_vm3 = vcmask 121856   ;;  %vm360_vm4 = vcmask 60416  }
  0x1e   :  { %416 = vmatprep.mubr.msk.bf16.mxu0 %vm533_vm1, %v532_v0  ;;  %436 = vmatprep.mubr.msk.bf16.mxu1 %vm533_vm1, %v532_v0  ;;  %v76_v2 = vsel %vm74_vm0, 4294967295, %v534_v1  ;;  %v53_v5 = vld [vmem:[#allocation2] sm:$0xff]  ;;  %v469_v10 = vld [vmem:[%s670_s3 + $0x30] sm:$0xff]   ;;  %v470_v11 = vld [vmem:[%s670_s3 + $0x28] sm:$0xff]  }
  0x1f   :  { %v77_v3 = vsel %vm75_vm2, %v76_v2, 0  ;;  %v55_v9 = vpack.c.bf16 %v54_v6, %v53_v5  ;;  %421 = vmatpush3.bf16.msra.mxu1 %v468_v8  ;;  %v471_v12 = vld [vmem:[%s670_s3 + $0x20] sm:$0xff]   ;;  %v472_v13 = vld [vmem:[%s670_s3 + $0x18] sm:$0xff]   ;;  %v473_v14 = vld [vmem:[%s670_s3 + $0x10] sm:$0xff]  }
  0x20   :  { %v79_v7 = vand.u32 %v467_v4, %v77_v3  ;;  %422 = vmatprep.subr.bf16.mxu1 %v532_v0  ;;  %v474_v15 = vld [vmem:[%s670_s3 + $0x8] sm:$0xff]   ;;  %v475_v16 = vld [vmem:[%s670_s3] sm:$0xff]   ;;  %v476_v17 = vld [vmem:[%s672_s5 + $0x38] sm:$0xff]  }
  0x21   :  { %v477_v18 = vld [vmem:[%s672_s5 + $0x30] sm:$0xff]   ;;  %v478_v19 = vld [vmem:[%s672_s5 + $0x28] sm:$0xff]   ;;  %v479_v20 = vld [vmem:[%s672_s5 + $0x20] sm:$0xff]  }
  0x22   :  { %415 = vmatpush3.bf16.msra.mxu0 %v79_v7  ;;  %v480_v21 = vld [vmem:[%s672_s5 + $0x18] sm:$0xff]   ;;  %v369_v22 = vld [vmem:[%s669_s2] ss:$0 sm:$0xff]  ;;  %v481_v32 = vld [vmem:[%s672_s5 + $0x10] sm:$0xff]  }
  0x23   :  { %440 = vmatprep.subr.bf16.mxu0 %v532_v0  ;;  %423 = vmatpush3.bf16.msra.mxu1 %v469_v10  ;;  %v482_v33 = vld [vmem:[%s672_s5 + $0x8] sm:$0xff]   ;;  %v483_v34 = vld [vmem:[%s672_s5] sm:$0xff]   ;;  %v372_v35 = vld [vmem:[#allocation4] ss:$0 sm:$0xff] }
  0x24   :  { %424 = vmatprep.subr.bf16.mxu1 %v532_v0  ;;  %v381_v45 = vld [vmem:[%s673_s6] ss:$0 sm:$0xff] }
  0x25   :  { %417 = vmatmul.mubr.msk.bf16.vlgmr.msra.gmra.mxu0 %vm70_vm3, %v55_v9 }
  0x26   :  { %456 = vmatprep.mubr.msk.bf16.mxu0 %vm533_vm1, %v532_v0  ;;  %441 = vmatpush3.bf16.msra.mxu0 %v476_v17 }
  0x27   :  { %425 = vmatpush3.bf16.msra.mxu1 %v470_v11  ;;  %442 = vmatprep.subr.bf16.mxu0 %v532_v0 }
  0x28   :  { %426 = vmatprep.subr.bf16.mxu1 %v532_v0 }
  0x2a   :  { %443 = vmatpush3.bf16.msra.mxu0 %v477_v18 }
  0x2b   :  { %427 = vmatpush3.bf16.msra.mxu1 %v471_v12  ;;  %444 = vmatprep.subr.bf16.mxu0 %v532_v0 }
  0x2c   :  { %428 = vmatprep.subr.bf16.mxu1 %v532_v0 }
  0x2e   :  { %445 = vmatpush3.bf16.msra.mxu0 %v478_v19 }
  0x2f   :  { %429 = vmatpush3.bf16.msra.mxu1 %v472_v13  ;;  %446 = vmatprep.subr.bf16.mxu0 %v532_v0 }
  0x30   :  { %430 = vmatprep.subr.bf16.mxu1 %v532_v0 }
  0x32   :  { %447 = vmatpush3.bf16.msra.mxu0 %v479_v20 }
  0x33   :  { %431 = vmatpush3.bf16.msra.mxu1 %v473_v14  ;;  %448 = vmatprep.subr.bf16.mxu0 %v532_v0 }
  0x34   :  { %432 = vmatprep.subr.bf16.mxu1 %v532_v0 }
  0x36   :  { %449 = vmatpush3.bf16.msra.mxu0 %v480_v21 }
  0x37   :  { %433 = vmatpush3.bf16.msra.mxu1 %v474_v15  ;;  %450 = vmatprep.subr.bf16.mxu0 %v532_v0 }
  0x38   :  { %434 = vmatprep.subr.bf16.mxu1 %v532_v0 }
  0x3a   :  { %451 = vmatpush3.bf16.msra.mxu0 %v481_v32 }
  0x3b   :  { %435 = vmatpush3.bf16.msra.mxu1 %v475_v16  ;;  %452 = vmatprep.subr.bf16.mxu0 %v532_v0 }
  0x3e   :  { %453 = vmatpush3.bf16.msra.mxu0 %v482_v33 }
  0x3f   :  { %454 = vmatprep.subr.bf16.mxu0 %v532_v0 }
  0x42   :  { %455 = vmatpush3.bf16.msra.mxu0 %v483_v34 }
  0xe5   :  { %v115_v23 = vpop.f32.mrf.mxu0 }
  0xe6   :  { %v116_v25 = vadd.f32 %v369_v22, %v115_v23 }
  0xe7   :  { %v418_v24 = vpop.f32.mrf.mxu0 }
  0xe8   :  { %v122_v29 = vmax.f32 %v116_v25, 0.0 }
  0xe9   :  { %v118_v26 = vpop.f32.mrf.mxu0 }
  0xea   :  { %v119_v27 = vadd.f32 %v369_v22, %v118_v26 }
  0xeb   :  { %v419_v28 = vpop.f32.mrf.mxu0 }
  0xec   :  { %v123_v30 = vmax.f32 %v119_v27, 0.0 }
  0xee   :  { %v124_v31 = vpack.c.bf16 %v123_v30, %v122_v29 }
  0xf0   :  { %437 = vmatmul.mubr.bf16.vlgmr.msra.gmra.mxu1 %v124_v31 }
 0x1b0   :  { %v230_v36 = vpop.f32.mrf.mxu1 }
 0x1b1   :  { %v231_v38 = vadd.f32 %v372_v35, %v230_v36 }
 0x1b2   :  { %v438_v37 = vpop.f32.mrf.mxu1 }
 0x1b3   :  { %v237_v42 = vmax.f32 %v231_v38, 0.0 }
 0x1b4   :  { %v233_v39 = vpop.f32.mrf.mxu1 }
 0x1b5   :  { %v234_v40 = vadd.f32 %v372_v35, %v233_v39 }
 0x1b6   :  { %v439_v41 = vpop.f32.mrf.mxu1 }
 0x1b7   :  { %v238_v43 = vmax.f32 %v234_v40, 0.0 }
 0x1b9   :  { %v239_v44 = vpack.c.bf16 %v238_v43, %v237_v42 }
 0x1bb   :  { %457 = vmatmul.mubr.bf16.vlgmr.msra.gmra.mxu0 %v239_v44 }
 0x27b   :  { %v345_v46 = vpop.f32.mrf.mxu0 }
 0x27c   :  { %v346_v47 = vadd.f32 %v381_v45, %v345_v46 }
 0x27d   :  { %v458_v48 = vpop.f32.mrf.mxu0 }
 0x27e   :  { %v392_v49 = vpack.c.bf16 %v346_v47, %v346_v47 }
 0x27f   :  { %v348_v50 = vpop.f32.mrf.mxu0 }
 0x280   :  { %361 = vst.msk [vmem:[%s674_s7] sm:$0xf] %vm360_vm4, %v392_v49  ;;  %v349_v51 = vadd.f32 %v381_v45, %v348_v50 }
 0x281   :  { %v459_v52 = vpop.f32.mrf.mxu0 }
 0x282   :  { %v393_v53 = vpack.c.bf16 %v349_v51, %v349_v51 }
 0x284   :  { %362 = vst.msk [vmem:[%s674_s7 + $0x4] sm:$0xf] %vm360_vm4, %v393_v53 }
 0x285   :  { %367 = vsyncpa [#allocation3], 1 }
 0x286   :  { %368 = vsyncpa [#allocation5], 1 }

</bundles_post_ra>
